<compile_context>
chip_gen: v7x
topology: tpu7x:2x2x1
jax: 0.10.0
libtpu: 0.0.40
codegen_flags: <defaults>
</compile_context>

<pallas_src>
import numpy as np
import jax
import jax.numpy as jnp
from jax import lax
from jax.experimental import pallas as pl
from jax.experimental.pallas import tpu as pltpu


# ----------------------------- parameter setup ------------------------------
def _gaussian_1d(window_size, sigma):
    g = np.array(
        [np.exp(-((x - window_size // 2) ** 2) / float(2 * sigma ** 2))
         for x in range(window_size)],
        dtype=np.float64,
    )
    return (g / g.sum()).astype(np.float32)


def _create_window(window_size):
    # 2-D window, used only by the pure-JAX reference.
    g = _gaussian_1d(window_size, 1.5)
    return np.outer(g, g).astype(np.float32)


def _band_matrix(n, g, pad):
    """Banded (n, n) matrix M with M[out, in] = g[in - out + pad] inside the
    band, 0 outside. Left-multiplying by M == 1-D 'same' convolution with the
    taps g and zero padding along that axis."""
    m = np.zeros((n, n), dtype=np.float32)
    for out in range(n):
        for d in range(-pad, pad + 1):
            i = out + d
            if 0 <= i < n:
                m[out, i] = g[d + pad]
    return m


def _block_diag(m, k):
    """k copies of square matrix m on the diagonal."""
    n = m.shape[0]
    out = np.zeros((k * n, k * n), dtype=np.float32)
    for i in range(k):
        out[i * n:(i + 1) * n, i * n:(i + 1) * n] = m
    return out


def _pick_cblk(bc, H, W, vmem_budget=12 * 2 ** 20):
    """Channels packed per grid step. Target cblk*W ~= 128 lanes (lane-dense),
    bounded by a conservative VMEM budget (fits v5e's 16 MiB scoped default).
    No divisibility requirement on bc (tail handled by channel padding)."""
    target = max(1, 128 // W) if W < 128 else 1
    cblk = max(1, min(bc, target))

    def step_bytes(c):
        cw = c * W
        # 2 inputs x 2 pipeline buffers + resident band matrices + output row
        return 4 * (2 * 2 * H * cw + cw * cw + (5 * H) ** 2 + 2 * cw)

    while cblk > 1 and step_bytes(cblk) > vmem_budget:
        cblk -= 1
    return cblk


# --------------------------------- kernel -----------------------------------
def _make_ssim_kernel(H, CW, data_range):
    C1 = (0.01 * data_range) ** 2
    C2 = (0.03 * data_range) ** 2

    def kernel(a5_ref, bw_ref, x1_ref, x2_ref, out_ref):
        # a5_ref : (5H, 5H)  block-diag (5 maps) row-pass band matrix (resident)
        # bw_ref : (CW, CW)  block-diag (cblk channels) column-pass band matrix
        # x1_ref/x2_ref : (1, H, CW) lane-dense channel-packed image blocks
        # out_ref: (1, 1, CW) per-lane (channel*W) column sums of the SSIM map
        a = x1_ref[0]            # (H, CW)
        b = x2_ref[0]

        # 5 pre-maps stacked along sublanes -> ONE matmul per conv pass.
        pre = jnp.concatenate([a, b, a * a, b * b, a * b], axis=0)      # (5H, CW)
        t = jnp.dot(pre, bw_ref[...], preferred_element_type=jnp.float32)   # W pass
        conv = jnp.dot(a5_ref[...], t, preferred_element_type=jnp.float32)  # H pass

        mu1 = conv[0 * H:1 * H]
        mu2 = conv[1 * H:2 * H]
        e11 = conv[2 * H:3 * H]
        e22 = conv[3 * H:4 * H]
        e12 = conv[4 * H:5 * H]

        mu1_sq = mu1 * mu1
        mu2_sq = mu2 * mu2
        mu1_mu2 = mu1 * mu2
        sigma1_sq = e11 - mu1_sq
        sigma2_sq = e22 - mu2_sq
        sigma12 = e12 - mu1_mu2

        num = (2.0 * mu1_mu2 + C1) * (2.0 * sigma12 + C2)
        den = (mu1_sq + mu2_sq + C1) * (sigma1_sq + sigma2_sq + C2)

        # EUP approx reciprocal + two Newton-Raphson steps (keeps VALU light,
        # restores full f32 accuracy for the 1e-4 check).
        r = pl.reciprocal(den, approx=True)
        r = r * (2.0 - den * r)
        r = r * (2.0 - den * r)
        ssim_map = num * r                                              # (H, CW)

        # Reduce over H in-kernel; lane-dense full-block store.
        out_ref[0] = jnp.sum(ssim_map, axis=0, keepdims=True)           # (1, CW)

    return kernel


# -------------------------------- wrapper ------------------------------------
def ssim_loss(img1, img2, window_size=11, data_range=1.0, size_average=True):
    """1 - SSIM, matching the PyTorch SSIMLoss.forward semantics (NCHW)."""
    assert img1.shape == img2.shape and img1.ndim == 4
    B, C, H, W = img1.shape
    pad = window_size // 2
    BC = B * C

    cblk = _pick_cblk(BC, H, W)
    nblk = -(-BC // cblk)                 # cdiv, no divisibility requirement
    BCp = nblk * cblk
    CW = cblk * W

    g = _gaussian_1d(window_size, 1.5)
    ah = _band_matrix(H, g, pad)          # (H, H):  out = ah @ x   (row pass)
    bw = _band_matrix(W, g, pad).T        # (W, W):  out = x @ bw   (col pass)
    a5 = _block_diag(ah, 5)               # (5H, 5H): 5 stacked maps
    bwc = _block_diag(bw, cblk)           # (CW, CW): cblk packed channels

    def pack(x):
        x = x.astype(jnp.float32).reshape(BC, H, W)
        if BCp != BC:                     # pad channels (discarded later)
            x = jnp.concatenate(
                [x, jnp.zeros((BCp - BC, H, W), jnp.float32)], axis=0)
        # (nblk, cblk, H, W) -> (nblk, H, cblk*W): channels along lanes.
        return x.reshape(nblk, cblk, H, W).transpose(0, 2, 1, 3).reshape(
            nblk, H, CW)

    x1 = pack(img1)
    x2 = pack(img2)

    kernel = _make_ssim_kernel(H, CW, data_range)

    flops_per_blk = 2 * (5 * H) * CW * CW + 2 * (5 * H) * (5 * H) * CW + 30 * H * CW
    cost = pl.CostEstimate(
        flops=int(nblk * flops_per_blk),
        transcendentals=int(nblk * H * CW),
        bytes_accessed=int(4 * (2 * nblk * H * CW + CW * CW
                                + 25 * H * H + nblk * CW)),
    )

    row_sums = pl.pallas_call(
        kernel,
        out_shape=jax.ShapeDtypeStruct((nblk, 1, CW), jnp.float32),
        grid=(nblk,),
        in_specs=[
            pl.BlockSpec((5 * H, 5 * H), lambda i: (0, 0)),     # A5 (resident)
            pl.BlockSpec((CW, CW), lambda i: (0, 0)),           # Bw (resident)
            pl.BlockSpec((1, H, CW), lambda i: (i, 0, 0)),
            pl.BlockSpec((1, H, CW), lambda i: (i, 0, 0)),
        ],
        out_specs=pl.BlockSpec((1, 1, CW), lambda i: (i, 0, 0)),
        compiler_params=pltpu.CompilerParams(
            dimension_semantics=("parallel",)),
        cost_estimate=cost,
    )(jnp.asarray(a5), jnp.asarray(bwc), x1, x2)

    # row_sums[i, 0, c*W + w] = sum over H of SSIM map for channel i*cblk + c.
    per_ch = jnp.sum(row_sums.reshape(nblk * cblk, W), axis=-1)[:BC]
    per_ch = per_ch.reshape(B, C) / float(H * W)
    if size_average:
        ssim = jnp.mean(per_ch)                 # scalar
    else:
        ssim = jnp.mean(per_ch, axis=1)         # (B,)
    return 1.0 - ssim


# ------------------------------ pure-JAX reference ---------------------------
def _ssim_loss_ref(img1, img2, window_size=11, data_range=1.0):
    B, C, H, W = img1.shape
    pad = window_size // 2
    w2d = jnp.asarray(_create_window(window_size))
    win = jnp.broadcast_to(w2d, (C, 1, window_size, window_size))

    def conv(x):
        return lax.conv_general_dilated(
            x, win, window_strides=(1, 1), padding=[(pad, pad), (pad, pad)],
            dimension_numbers=("NCHW", "OIHW", "NCHW"), feature_group_count=C)

    mu1, mu2 = conv(img1), conv(img2)
    mu1_sq, mu2_sq, mu1_mu2 = mu1 * mu1, mu2 * mu2, mu1 * mu2
    s1 = conv(img1 * img1) - mu1_sq
    s2 = conv(img2 * img2) - mu2_sq
    s12 = conv(img1 * img2) - mu1_mu2
    C1 = (0.01 * data_range) ** 2
    C2 = (0.03 * data_range) ** 2
    ssim_map = (2 * mu1_mu2 + C1) * (2 * s12 + C2) / (
        (mu1_sq + mu2_sq + C1) * (s1 + s2 + C2))
    return 1.0 - jnp.mean(ssim_map)


# ---------------------------------- main --------------------------------------
if __name__ == "__main__":
    key = jax.random.PRNGKey(0)
    k1, k2 = jax.random.split(key)
    B, C, H, W = 2, 4, 16, 16
    img1 = jax.random.uniform(k1, (B, C, H, W), dtype=jnp.float32)
    img2 = jax.random.uniform(k2, (B, C, H, W), dtype=jnp.float32)

    loss = ssim_loss(img1, img2, window_size=11, data_range=1.0,
                     size_average=True)
    loss = jax.block_until_ready(loss)

    ref = jax.block_until_ready(_ssim_loss_ref(img1, img2))
    assert np.allclose(np.asarray(loss), np.asarray(ref), rtol=1e-4, atol=1e-4), (
        float(loss), float(ref))

    print("KERNEL_OK")
</pallas_src>

<mosaic_0001>
module attributes {stable_mosaic.version = 11 : i64} {
  func.func @kernel(%arg0: i32, %arg1: memref<80x80xf32, #tpu.memory_space<vmem>>, %arg2: memref<128x128xf32, #tpu.memory_space<vmem>>, %arg3: memref<1x16x128xf32, #tpu.memory_space<vmem>>, %arg4: memref<1x16x128xf32, #tpu.memory_space<vmem>>, %arg5: memref<1x1x128xf32, #tpu.memory_space<vmem>>) attributes {dimension_semantics = [#tpu.dimension_semantics<parallel>], iteration_bounds = array<i64: 1>, scalar_prefetch = 0 : i64, scratch_operands = 0 : i64, tpu.core_type = #tpu.core_type<tc>, window_params = [{pipeline_mode = #tpu.pipeline_mode<synchronous>, transform_indices = @transform_0, window_bounds = array<i64: 80, 80>}, {pipeline_mode = #tpu.pipeline_mode<synchronous>, transform_indices = @transform_1, window_bounds = array<i64: 128, 128>}, {transform_indices = @transform_2, window_bounds = array<i64: 1, 16, 128>}, {transform_indices = @transform_3, window_bounds = array<i64: 1, 16, 128>}, {transform_indices = @transform_4, window_bounds = array<i64: 1, 1, 128>}]} {
    %c0 = arith.constant 0 : index
    %c0_0 = arith.constant 0 : index
    %c0_1 = arith.constant 0 : index
    %0 = vector.load %arg3[%c0, %c0_0, %c0_1] : memref<1x16x128xf32, #tpu.memory_space<vmem>>, vector<1x16x128xf32>
    %1 = vector.shape_cast %0 : vector<1x16x128xf32> to vector<16x128xf32>
    %c0_2 = arith.constant 0 : index
    %c0_3 = arith.constant 0 : index
    %c0_4 = arith.constant 0 : index
    %2 = vector.load %arg4[%c0_2, %c0_3, %c0_4] : memref<1x16x128xf32, #tpu.memory_space<vmem>>, vector<1x16x128xf32>
    %3 = vector.shape_cast %2 : vector<1x16x128xf32> to vector<16x128xf32>
    %4 = arith.mulf %1, %1 : vector<16x128xf32>
    %5 = arith.mulf %3, %3 : vector<16x128xf32>
    %6 = arith.mulf %1, %3 : vector<16x128xf32>
    %7 = tpu.concatenate %1, %3, %4, %5, %6 in 0 : vector<16x128xf32>, vector<16x128xf32>, vector<16x128xf32>, vector<16x128xf32>, vector<16x128xf32> -> vector<80x128xf32>
    %c0_5 = arith.constant 0 : index
    %c0_6 = arith.constant 0 : index
    %8 = vector.load %arg2[%c0_5, %c0_6] : memref<128x128xf32, #tpu.memory_space<vmem>>, vector<128x128xf32>
    %cst = arith.constant dense<0.000000e+00> : vector<80x128xf32>
    %9 = tpu.matmul %7, %8, %cst {dimension_numbers = #tpu.dot_dimension_numbers<[1], [0], [0], [1], [0, 0, 1, 1], [], []>} : vector<80x128xf32>, vector<128x128xf32>, vector<80x128xf32> -> vector<80x128xf32>
    %c0_7 = arith.constant 0 : index
    %c0_8 = arith.constant 0 : index
    %10 = vector.load %arg1[%c0_7, %c0_8] : memref<80x80xf32, #tpu.memory_space<vmem>>, vector<80x80xf32>
    %cst_9 = arith.constant dense<0.000000e+00> : vector<80x128xf32>
    %11 = tpu.matmul %10, %9, %cst_9 {dimension_numbers = #tpu.dot_dimension_numbers<[1], [0], [0], [1], [0, 0, 1, 1], [], []>} : vector<80x80xf32>, vector<80x128xf32>, vector<80x128xf32> -> vector<80x128xf32>
    %12 = vector.extract_strided_slice %11 {offsets = [0, 0], sizes = [16, 128], strides = [1, 1]} : vector<80x128xf32> to vector<16x128xf32>
    %13 = vector.extract_strided_slice %11 {offsets = [16, 0], sizes = [16, 128], strides = [1, 1]} : vector<80x128xf32> to vector<16x128xf32>
    %14 = vector.extract_strided_slice %11 {offsets = [32, 0], sizes = [16, 128], strides = [1, 1]} : vector<80x128xf32> to vector<16x128xf32>
    %15 = vector.extract_strided_slice %11 {offsets = [48, 0], sizes = [16, 128], strides = [1, 1]} : vector<80x128xf32> to vector<16x128xf32>
    %16 = vector.extract_strided_slice %11 {offsets = [64, 0], sizes = [16, 128], strides = [1, 1]} : vector<80x128xf32> to vector<16x128xf32>
    %17 = arith.mulf %12, %12 : vector<16x128xf32>
    %18 = arith.mulf %13, %13 : vector<16x128xf32>
    %19 = arith.mulf %12, %13 : vector<16x128xf32>
    %20 = arith.subf %14, %17 : vector<16x128xf32>
    %21 = arith.subf %15, %18 : vector<16x128xf32>
    %22 = arith.subf %16, %19 : vector<16x128xf32>
    %cst_10 = arith.constant 2.000000e+00 : f32
    %23 = vector.broadcast %cst_10 : f32 to vector<16x128xf32>
    %24 = arith.mulf %23, %19 : vector<16x128xf32>
    %cst_11 = arith.constant 9.99999974E-5 : f32
    %25 = vector.broadcast %cst_11 : f32 to vector<16x128xf32>
    %26 = arith.addf %24, %25 : vector<16x128xf32>
    %cst_12 = arith.constant 2.000000e+00 : f32
    %27 = vector.broadcast %cst_12 : f32 to vector<16x128xf32>
    %28 = arith.mulf %27, %22 : vector<16x128xf32>
    %cst_13 = arith.constant 8.99999984E-4 : f32
    %29 = vector.broadcast %cst_13 : f32 to vector<16x128xf32>
    %30 = arith.addf %28, %29 : vector<16x128xf32>
    %31 = arith.mulf %26, %30 : vector<16x128xf32>
    %32 = arith.addf %17, %18 : vector<16x128xf32>
    %cst_14 = arith.constant 9.99999974E-5 : f32
    %33 = vector.broadcast %cst_14 : f32 to vector<16x128xf32>
    %34 = arith.addf %32, %33 : vector<16x128xf32>
    %35 = arith.addf %20, %21 : vector<16x128xf32>
    %cst_15 = arith.constant 8.99999984E-4 : f32
    %36 = vector.broadcast %cst_15 : f32 to vector<16x128xf32>
    %37 = arith.addf %35, %36 : vector<16x128xf32>
    %38 = arith.mulf %34, %37 : vector<16x128xf32>
    %39 = tpu.reciprocal %38 {approx = true} : vector<16x128xf32> -> vector<16x128xf32>
    %40 = arith.mulf %38, %39 : vector<16x128xf32>
    %cst_16 = arith.constant 2.000000e+00 : f32
    %41 = vector.broadcast %cst_16 : f32 to vector<16x128xf32>
    %42 = arith.subf %41, %40 : vector<16x128xf32>
    %43 = arith.mulf %39, %42 : vector<16x128xf32>
    %44 = arith.mulf %38, %43 : vector<16x128xf32>
    %cst_17 = arith.constant 2.000000e+00 : f32
    %45 = vector.broadcast %cst_17 : f32 to vector<16x128xf32>
    %46 = arith.subf %45, %44 : vector<16x128xf32>
    %47 = arith.mulf %43, %46 : vector<16x128xf32>
    %48 = arith.mulf %31, %47 : vector<16x128xf32>
    %cst_18 = arith.constant dense<0.000000e+00> : vector<128xf32>
    %49 = vector.multi_reduction <add>, %48, %cst_18 [0] : vector<16x128xf32> to vector<128xf32>
    %50 = vector.shape_cast %49 : vector<128xf32> to vector<1x128xf32>
    %c0_19 = arith.constant 0 : index
    %c0_20 = arith.constant 0 : index
    %c0_21 = arith.constant 0 : index
    %51 = vector.load %arg5[%c0_19, %c0_20, %c0_21] : memref<1x1x128xf32, #tpu.memory_space<vmem>>, vector<1x1x128xf32>
    %52 = vector.shape_cast %51 : vector<1x1x128xf32> to vector<1x128xf32>
    %53 = vector.shape_cast %50 : vector<1x128xf32> to vector<1x1x128xf32>
    tpu.vector_store %arg5[%c0_19, %c0_20, %c0_21], %53 {strides = array<i32>} : memref<1x1x128xf32, #tpu.memory_space<vmem>>, vector<1x1x128xf32>,
    return
  }
  func.func @transform_0(%arg0: i32) -> (i32, i32) {
    %c0_i32 = arith.constant 0 : i32
    %c0_i32_0 = arith.constant 0 : i32
    %c0_i32_1 = arith.constant 0 : i32
    return %c0_i32, %c0_i32_0 : i32, i32
  }
  func.func @transform_1(%arg0: i32) -> (i32, i32) {
    %c0_i32 = arith.constant 0 : i32
    %c0_i32_0 = arith.constant 0 : i32
    %c0_i32_1 = arith.constant 0 : i32
    return %c0_i32, %c0_i32_0 : i32, i32
  }
  func.func @transform_2(%arg0: i32) -> (i32, i32, i32) {
    %c0_i32 = arith.constant 0 : i32
    %c0_i32_0 = arith.constant 0 : i32
    %c0_i32_1 = arith.constant 0 : i32
    return %arg0, %c0_i32, %c0_i32_0 : i32, i32, i32
  }
  func.func @transform_3(%arg0: i32) -> (i32, i32, i32) {
    %c0_i32 = arith.constant 0 : i32
    %c0_i32_0 = arith.constant 0 : i32
    %c0_i32_1 = arith.constant 0 : i32
    return %arg0, %c0_i32, %c0_i32_0 : i32, i32, i32
  }
  func.func @transform_4(%arg0: i32) -> (i32, i32, i32) {
    %c0_i32 = arith.constant 0 : i32
    %c0_i32_0 = arith.constant 0 : i32
    %c0_i32_1 = arith.constant 0 : i32
    return %arg0, %c0_i32, %c0_i32_0 : i32, i32, i32
  }
}

</mosaic_0001>

<bundles_post_ra>
// kernel: tpu_custom_call.1
= control target key start
LH: loop header
LB: loop body
LE: loop exit
PB: predicated region body
PF: predicated region fallthrough
CT: control target
= control target key end

     0   :  { %9 = vsyncpa [#allocation3], 0  ;;  %s890_s0 = inlined_call_operand.hbm [shape: f32[80,80], index: 0, kind: input, shape index: {}]   ;;  %s891_s1 = inlined_call_operand.hbm [shape: f32[128,128], index: 1, kind: input, shape index: {}]   ;;  %s892_s2 = inlined_call_operand.hbm [shape: f32[1,16,128], index: 2, kind: input, shape index: {}]   ;;  %s893_s3 = inlined_call_operand.hbm [shape: f32[1,16,128], index: 3, kind: input, shape index: {}]   ;;  %s894_s4 = inlined_call_operand.hbm [shape: f32[1,1,128], index: 4, kind: output, shape index: {}]  }
   0x1   :  { %10 = vsyncpa [#allocation6], 0 }
   0x2   :  { %11 = vsyncpa [#allocation9], 0 }
   0x3   :  { %12 = vsyncpa [#allocation4], 0  ;;  %s762_s15 = smov [#allocation5]   ;;  %s763_s17 = smov [#allocation2]  }
   0x4   :  { %s30_s16 = sshll.u32 %s762_s15, 4  ;;  %s18_s18 = sshll.u32 %s763_s17, 4  ;;  %s31_s16 = int_to_ptr.vmem [resolvable:$true] %s30_s16  ;;  %s794_s18 = int_to_ptr.vmem [resolvable:$true] %s18_s18 }
   0x5   :  { %s644_s21 = scalar_lea.hbm %s891_s1, 2048 }
   0x6   :  { %p645_p0 = scmp.ne.s32.totalorder %s891_s1, %s644_s21  ;;  %p648_p1 = scmp.lt.u32.totalorder %s644_s21, %s891_s1 }
   0x8   :  { %p650_p2 = pnand %p648_p1, %p645_p0 }
   0xa   :  { %653 = shalt.err (!%p650_p2)
}
   0xb   :  { %s654_s26 = scalar_lea.vmem %s31_s16, 2048  ;;  %p659_p4 = scmp.lt.s32.totalorder %s31_s16, %s31_s16 }
   0xc   :  { %p655_p3 = scmp.ne.s32.totalorder %s31_s16, %s654_s26  ;;  %p660_p5 = scmp.lt.s32.totalorder %s654_s26, %s654_s26 }
   0xe   :  { %p661_p6 = por %p660_p5, %p659_p4 }
  0x10   :  { %p662_p7 = pnand %p661_p6, %p655_p3 }
  0x12   :  { %665 = shalt.err (!%p662_p7)
}
  0x13   :  { %s764_s27 = smov 128   ;;  %s765_s28 = smov 8  }
  0x14   :  { %36 = dma.hbm_to_vmem [thread:$0]  %s891_s1, 2048, %s31_s16, [#allocation6], %s764_s27, %s764_s27, %s765_s28  }
  0x15   :  { %s666_s7 = scalar_lea.hbm %s890_s0, 1280 }
  0x16   :  { %p667_p8 = scmp.ne.s32.totalorder %s890_s0, %s666_s7  ;;  %p670_p9 = scmp.lt.u32.totalorder %s666_s7, %s890_s0 }
  0x18   :  { %p672_p10 = pnand %p670_p9, %p667_p8 }
  0x1a   :  { %675 = shalt.err (!%p672_p10)
}
  0x1b   :  { %s676_s12 = scalar_lea.vmem %s794_s18, 1280  ;;  %p681_p12 = scmp.lt.s32.totalorder %s794_s18, %s794_s18 }
  0x1c   :  { %p677_p11 = scmp.ne.s32.totalorder %s794_s18, %s676_s12  ;;  %p682_p13 = scmp.lt.s32.totalorder %s676_s12, %s676_s12 }
  0x1e   :  { %p683_p0 = por %p682_p13, %p681_p12 }
  0x20   :  { %p684_p1 = pnand %p683_p0, %p677_p11 }
  0x22   :  { %687 = shalt.err (!%p684_p1)
}
  0x23   :  { %24 = dma.hbm_to_vmem [thread:$0]  %s890_s0, 1280, %s794_s18, [#allocation3], %s764_s27, %s764_s27, %s765_s28  }
  0x24   :  { %s766_s14 = smov [#allocation7]   ;;  %s767_s16 = smov [#allocation8]  }
  0x25   :  { %s42_s15 = sshll.u32 %s766_s14, 4  ;;  %s54_s17 = sshll.u32 %s767_s16, 4  ;;  %s43_s15 = int_to_ptr.vmem [resolvable:$true] %s42_s15  ;;  %s831_s17 = int_to_ptr.vmem [resolvable:$true] %s54_s17 }
  0x26   :  { %s688_s21 = scalar_lea.hbm %s892_s2, 256 }
  0x27   :  { %p689_p2 = scmp.ne.s32.totalorder %s892_s2, %s688_s21  ;;  %p692_p3 = scmp.lt.u32.totalorder %s688_s21, %s892_s2 }
  0x29   :  { %p694_p4 = pnand %p692_p3, %p689_p2 }
  0x2b   :  { %697 = shalt.err (!%p694_p4)
}
  0x2c   :  { %s698_s0 = scalar_lea.vmem %s43_s15, 256  ;;  %p703_p6 = scmp.lt.s32.totalorder %s43_s15, %s43_s15 }
  0x2d   :  { %p699_p5 = scmp.ne.s32.totalorder %s43_s15, %s698_s0  ;;  %p704_p7 = scmp.lt.s32.totalorder %s698_s0, %s698_s0 }
  0x2f   :  { %p705_p8 = por %p704_p7, %p703_p6 }
  0x31   :  { %p706_p9 = pnand %p705_p8, %p699_p5 }
  0x33   :  { %709 = shalt.err (!%p706_p9)
}
  0x34   :  { %48 = dma.hbm_to_vmem [thread:$0]  %s892_s2, 256, %s43_s15, [#allocation6], %s764_s27, %s764_s27, %s765_s28  }
  0x35   :  { %s710_s5 = scalar_lea.hbm %s893_s3, 256 }
  0x36   :  { %p711_p10 = scmp.ne.s32.totalorder %s893_s3, %s710_s5  ;;  %p714_p11 = scmp.lt.u32.totalorder %s710_s5, %s893_s3 }
  0x38   :  { %p716_p12 = pnand %p714_p11, %p711_p10 }
  0x3a   :  { %719 = shalt.err (!%p716_p12)
}
  0x3b   :  { %s720_s10 = scalar_lea.vmem %s831_s17, 256  ;;  %p725_p0 = scmp.lt.s32.totalorder %s831_s17, %s831_s17 }
  0x3c   :  { %p721_p13 = scmp.ne.s32.totalorder %s831_s17, %s720_s10  ;;  %p726_p1 = scmp.lt.s32.totalorder %s720_s10, %s720_s10 }
  0x3e   :  { %p727_p2 = por %p726_p1, %p725_p0 }
  0x40   :  { %p728_p3 = pnand %p727_p2, %p721_p13 }
  0x42   :  { %731 = shalt.err (!%p728_p3)
}
  0x43   :  { %60 = dma.hbm_to_vmem [thread:$0]  %s893_s3, 256, %s831_s17, [#allocation9], %s764_s27, %s764_s27, %s765_s28  }
  0x44   :  { %754 = dma.done.wait [#allocation3], 1280  }
  0x45   :  { %755 = vsyncadd [#allocation3], 4294966016 }
  0x46   :  { %756 = dma.done.wait [#allocation6], 2304  }
  0x47   :  { %757 = vsyncadd [#allocation6], 4294964992 }
  0x48   :  { %758 = dma.done.wait [#allocation9], 256  }
  0x49   :  { %759 = vsyncadd [#allocation9], 4294967040  ;;  %v83_v0 = vld [vmem:[#allocation5] sm:$0xff]  ;;  %v84_v1 = vld [vmem:[#allocation5 + $0x8] sm:$0xff]  ;;  %vm224_vm0 = vcmask 654336   ;;  %s768_s3 = smov [#allocation10]  }
  0x4a   :  { %v85_v2 = vld [vmem:[#allocation5 + $0x10] sm:$0xff]  ;;  %v581_v3 = vpack.c.bf16 %v84_v1, %v83_v0  ;;  %v86_v4 = vld [vmem:[#allocation5 + $0x18] sm:$0xff]  ;;  %v87_v6 = vld [vmem:[#allocation5 + $0x20] sm:$0xff]  ;;  %s432_s27 = sshll.u32 %s768_s3, 4  ;;  %s433_s27 = int_to_ptr.vmem [resolvable:$true] %s432_s27 }
  0x4b   :  { %v585_v5 = vpack.c.bf16 %v86_v4, %v85_v2  ;;  %v88_v7 = vld [vmem:[#allocation5 + $0x28] sm:$0xff]  ;;  %v73_v9 = vld [vmem:[#allocation7] sm:$0xff]  ;;  %v89_v10 = vld [vmem:[#allocation5 + $0x30] sm:$0xff]  ;;  %s732_s28 = scalar_lea.vmem %s433_s27, 16  ;;  %s736_s12 = scalar_lea.vmem %s433_s27, 32 }
  0x4c   :  { %582 = vmatprep.subr.bf16.mxu0 %v581_v3  ;;  %v589_v8 = vpack.c.bf16 %v88_v7, %v87_v6  ;;  %v90_v11 = vld [vmem:[#allocation5 + $0x38] sm:$0xff]  ;;  %531 = vmatprep.mubr.f32.mxu0 %v73_v9  ;;  %v91_v13 = vld [vmem:[#allocation5 + $0x40] sm:$0xff]  ;;  %v92_v14 = vld [vmem:[#allocation5 + $0x48] sm:$0xff]  ;;  %v77_v28 = vmul.f32 %v73_v9, %v73_v9  ;;  %p733_p4 = scmp.ne.s32.totalorder %s433_s27, %s732_s28  ;;  %p737_p5 = scmp.lt.s32.totalorder %s433_s27, %s433_s27 }
  0x4d   :  { %584 = vmatpush3.bf16.msra.mxu0 %v581_v3  ;;  %v593_v12 = vpack.c.bf16 %v90_v11, %v89_v10  ;;  %v597_v15 = vpack.c.bf16 %v92_v14, %v91_v13  ;;  %v93_v16 = vld [vmem:[#allocation5 + $0x50] sm:$0xff]  ;;  %v94_v17 = vld [vmem:[#allocation5 + $0x58] sm:$0xff]  ;;  %v95_v19 = vld [vmem:[#allocation5 + $0x60] sm:$0xff]  ;;  %p738_p6 = scmp.lt.s32.totalorder %s736_s12, %s732_s28 }
  0x4e   :  { %586 = vmatprep.subr.bf16.mxu0 %v585_v5  ;;  %v601_v18 = vpack.c.bf16 %v94_v17, %v93_v16  ;;  %v96_v20 = vld [vmem:[#allocation5 + $0x68] sm:$0xff]  ;;  %v97_v22 = vld [vmem:[#allocation5 + $0x70] sm:$0xff]  ;;  %v98_v23 = vld [vmem:[#allocation5 + $0x78] sm:$0xff] }
  0x4f   :  { %v605_v21 = vpack.c.bf16 %v96_v20, %v95_v19  ;;  %v609_v24 = vpack.c.bf16 %v98_v23, %v97_v22  ;;  %v74_v25 = vld [vmem:[#allocation7 + $0x8] sm:$0xff]  ;;  %v75_v26 = vld [vmem:[#allocation8] sm:$0xff]  ;;  %v76_v27 = vld [vmem:[#allocation8 + $0x8] sm:$0xff]  ;;  %p739_p7 = por %p738_p6, %p737_p5 }
  0x50   :  { %v78_v29 = vmul.f32 %v74_v25, %v74_v25  ;;  %v79_v30 = vmul.f32 %v75_v26, %v75_v26  ;;  %v80_v31 = vmul.f32 %v76_v27, %v76_v27  ;;  %v81_v32 = vmul.f32 %v75_v26, %v73_v9  ;;  %v214_v34 = vld [vmem:[#allocation2] sm:$0xff]  ;;  %v215_v50 = vld [vmem:[#allocation2 + $0x8] sm:$0xff]  ;;  %v216_v51 = vld [vmem:[#allocation2 + $0x10] sm:$0xff] }
  0x51   :  { %588 = vmatpush3.bf16.msra.mxu0 %v585_v5  ;;  %v82_v33 = vmul.f32 %v76_v27, %v74_v25  ;;  %566 = vmatprep.mubr.msk.f32.mxu1 %vm224_vm0, %v214_v34  ;;  %v217_v52 = vld [vmem:[#allocation2 + $0x18] sm:$0xff]  ;;  %v218_v53 = vld [vmem:[#allocation2 + $0x20] sm:$0xff]  ;;  %v219_v54 = vld [vmem:[#allocation2 + $0x28] sm:$0xff]  ;;  %p740_p8 = pnand %p739_p7, %p733_p4 }
  0x52   :  { %590 = vmatprep.subr.bf16.mxu0 %v589_v8  ;;  %v220_v55 = vld [vmem:[#allocation2 + $0x30] sm:$0xff]  ;;  %v221_v56 = vld [vmem:[#allocation2 + $0x38] sm:$0xff]  ;;  %v222_v57 = vld [vmem:[#allocation2 + $0x40] sm:$0xff] }
  0x53   :  { %v223_v58 = vld [vmem:[#allocation2 + $0x48] sm:$0xff] }
  0x55   :  { %592 = vmatpush3.bf16.msra.mxu0 %v589_v8 }
  0x56   :  { %594 = vmatprep.subr.bf16.mxu0 %v593_v12 }
  0x59   :  { %596 = vmatpush3.bf16.msra.mxu0 %v593_v12 }
  0x5a   :  { %598 = vmatprep.subr.bf16.mxu0 %v597_v15 }
  0x5d   :  { %600 = vmatpush3.bf16.msra.mxu0 %v597_v15 }
  0x5e   :  { %602 = vmatprep.subr.bf16.mxu0 %v601_v18 }
  0x61   :  { %604 = vmatpush3.bf16.msra.mxu0 %v601_v18 }
  0x62   :  { %606 = vmatprep.subr.bf16.mxu0 %v605_v21 }
  0x65   :  { %608 = vmatpush3.bf16.msra.mxu0 %v605_v21 }
  0x66   :  { %610 = vmatprep.subr.bf16.mxu0 %v609_v24 }
  0x69   :  { %612 = vmatpush3.bf16.msra.mxu0 %v609_v24 }
  0x6c   :  { %532 = vmatmul.mubr.f32.vlgmr.msra.gmra.mrb[0].mxu0 %v74_v25 }
  0x6d   :  { %534 = vmatprep.mubr.f32.mxu0 %v75_v26 }
  0x70   :  { %535 = vmatmul.mubr.f32.gmra.mrb[2].mxu0 %v76_v27 }
  0x71   :  { %537 = vmatprep.mubr.f32.mxu0 %v77_v28 }
  0x74   :  { %538 = vmatmul.mubr.f32.gmra.mrb[4].mxu0 %v78_v29 }
  0x75   :  { %540 = vmatprep.mubr.f32.mxu0 %v79_v30 }
  0x78   :  { %541 = vmatmul.mubr.f32.gmra.mrb[6].mxu0 %v80_v31 }
  0x79   :  { %543 = vmatprep.mubr.f32.mxu0 %v81_v32 }
  0x7c   :  { %544 = vmatmul.mubr.f32.gmra.mrb[8].mxu0 %v82_v33 }
 0x13f   :  { %v533_v35 = vpop.f32.mrb[0].mxu0 }
 0x140   :  { %v165_v36 = vpop.f32.mrb[1].mxu0 }
 0x141   :  { %v613_v37 = vpack.c.bf16 %v533_v35, %v165_v36 }
 0x143   :  { %v536_v38 = vpop.f32.mrb[2].mxu0  ;;  %614 = vmatprep.subr.bf16.mxu1 %v613_v37 }
 0x144   :  { %v175_v39 = vpop.f32.mrb[3].mxu0  ;;  %616 = vmatpush3.bf16.msra.mxu1 %v613_v37 }
 0x145   :  { %v617_v40 = vpack.c.bf16 %v536_v38, %v175_v39 }
 0x147   :  { %v539_v41 = vpop.f32.mrb[4].mxu0  ;;  %618 = vmatprep.subr.bf16.mxu1 %v617_v40 }
 0x148   :  { %v185_v42 = vpop.f32.mrb[5].mxu0  ;;  %620 = vmatpush3.bf16.msra.mxu1 %v617_v40 }
 0x149   :  { %v621_v43 = vpack.c.bf16 %v539_v41, %v185_v42 }
 0x14b   :  { %v542_v44 = vpop.f32.mrb[6].mxu0  ;;  %622 = vmatprep.subr.bf16.mxu1 %v621_v43 }
 0x14c   :  { %v195_v45 = vpop.f32.mrb[7].mxu0  ;;  %624 = vmatpush3.bf16.msra.mxu1 %v621_v43 }
 0x14d   :  { %v625_v46 = vpack.c.bf16 %v542_v44, %v195_v45 }
 0x14f   :  { %v545_v47 = vpop.f32.mrb[8].mxu0  ;;  %626 = vmatprep.subr.bf16.mxu1 %v625_v46 }
 0x150   :  { %v205_v48 = vpop.f32.mrb[9].mxu0  ;;  %628 = vmatpush3.bf16.msra.mxu1 %v625_v46 }
 0x151   :  { %v629_v49 = vpack.c.bf16 %v545_v47, %v205_v48 }
 0x153   :  { %630 = vmatprep.subr.bf16.mxu1 %v629_v49 }
 0x154   :  { %632 = vmatpush3.bf16.msra.mxu1 %v629_v49 }
 0x157   :  { %567 = vmatmul.mubr.msk.f32.vlgmr.msra.gmra.mrb[0].mxu1 %vm224_vm0, %v215_v50 }
 0x158   :  { %569 = vmatprep.mubr.msk.f32.mxu1 %vm224_vm0, %v216_v51 }
 0x15b   :  { %570 = vmatmul.mubr.msk.f32.gmra.mrb[2].mxu1 %vm224_vm0, %v217_v52 }
 0x15c   :  { %572 = vmatprep.mubr.msk.f32.mxu1 %vm224_vm0, %v218_v53 }
 0x15f   :  { %573 = vmatmul.mubr.msk.f32.gmra.mrb[4].mxu1 %vm224_vm0, %v219_v54 }
 0x160   :  { %575 = vmatprep.mubr.msk.f32.mxu1 %vm224_vm0, %v220_v55 }
 0x163   :  { %576 = vmatmul.mubr.msk.f32.gmra.mrb[6].mxu1 %vm224_vm0, %v221_v56 }
 0x164   :  { %578 = vmatprep.mubr.msk.f32.mxu1 %vm224_vm0, %v222_v57 }
 0x167   :  { %579 = vmatmul.mubr.msk.f32.gmra.mrb[8].mxu1 %vm224_vm0, %v223_v58 }
 0x22a   :  { %v568_v59 = vpop.f32.mrb[0].mxu1 }
 0x22b   :  { %v321_v60 = vpop.f32.mrb[1].mxu1  ;;  %v371_v62 = vmul.f32 %v568_v59, %v568_v59 }
 0x22c   :  { %v370_v2 = vmul.f32 %v321_v60, %v321_v60 }
 0x22e   :  { %v571_v61 = vpop.f32.mrb[2].mxu1 }
 0x22f   :  { %v373_v63 = vmul.f32 %v571_v61, %v571_v61  ;;  %v375_v0 = vmul.f32 %v571_v61, %v568_v59  ;;  %v331_v1 = vpop.f32.mrb[3].mxu1 }
 0x230   :  { %v372_v3 = vmul.f32 %v331_v1, %v331_v1  ;;  %v374_v4 = vmul.f32 %v331_v1, %v321_v60 }
 0x231   :  { %v393_v5 = vadd.f32 %v373_v63, %v371_v62  ;;  %v383_v18 = vmul.f32 2.0, %v375_v0 }
 0x232   :  { %v392_v6 = vadd.f32 %v372_v3, %v370_v2  ;;  %v574_v7 = vpop.f32.mrb[4].mxu1  ;;  %v382_v23 = vmul.f32 2.0, %v374_v4 }
 0x233   :  { %v377_v8 = vsub.f32 %v574_v7, %v371_v62  ;;  %v341_v9 = vpop.f32.mrb[5].mxu1  ;;  %v395_v19 = vadd.f32 0.0001, %v393_v5  ;;  %v385_v31 = vadd.f32 0.0001, %v383_v18 }
 0x234   :  { %v376_v10 = vsub.f32 %v341_v9, %v370_v2  ;;  %v394_v24 = vadd.f32 0.0001, %v392_v6  ;;  %v384_v33 = vadd.f32 0.0001, %v382_v23 }
 0x236   :  { %v577_v11 = vpop.f32.mrb[6].mxu1 }
 0x237   :  { %v379_v12 = vsub.f32 %v577_v11, %v373_v63  ;;  %v351_v13 = vpop.f32.mrb[7].mxu1 }
 0x238   :  { %v378_v14 = vsub.f32 %v351_v13, %v372_v3 }
 0x239   :  { %v397_v15 = vadd.f32 %v379_v12, %v377_v8 }
 0x23a   :  { %v396_v16 = vadd.f32 %v378_v14, %v376_v10  ;;  %v580_v17 = vpop.f32.mrb[8].mxu1 }
 0x23b   :  { %v399_v20 = vadd.f32 0.0009, %v397_v15  ;;  %v381_v21 = vsub.f32 %v580_v17, %v375_v0  ;;  %v361_v22 = vpop.f32.mrb[9].mxu1 }
 0x23c   :  { %v398_v25 = vadd.f32 0.0009, %v396_v16  ;;  %v380_v26 = vsub.f32 %v361_v22, %v374_v4 }
 0x23d   :  { %v401_v27 = vmul.f32 %v399_v20, %v395_v19  ;;  %v387_v28 = vmul.f32 2.0, %v381_v21 }
 0x23e   :  { %v400_v29 = vmul.f32 %v398_v25, %v394_v24  ;;  %v386_v30 = vmul.f32 2.0, %v380_v26 }
 0x23f   :  { %640 = vrcp.f32 %v401_v27  ;;  %v389_v32 = vadd.f32 0.0009, %v387_v28 }
 0x240   :  { %642 = vrcp.f32 %v400_v29  ;;  %v388_v34 = vadd.f32 0.0009, %v386_v30 }
 0x241   :  { %v391_v35 = vmul.f32 %v389_v32, %v385_v31 }
 0x242   :  { %v390_v36 = vmul.f32 %v388_v34, %v384_v33 }
 0x249   :  { %v641_v37 = vpop.eup %640 }
 0x24a   :  { %v643_v38 = vpop.eup %642  ;;  %v405_v39 = vmul.f32 %v641_v37, %v401_v27 }
 0x24b   :  { %v404_v40 = vmul.f32 %v643_v38, %v400_v29 }
 0x24c   :  { %v407_v41 = vsub.f32 2.0, %v405_v39 }
 0x24d   :  { %v406_v42 = vsub.f32 2.0, %v404_v40 }
 0x24e   :  { %v409_v43 = vmul.f32 %v641_v37, %v407_v41 }
 0x24f   :  { %v408_v44 = vmul.f32 %v643_v38, %v406_v42 }
 0x250   :  { %v411_v45 = vmul.f32 %v409_v43, %v401_v27 }
 0x251   :  { %v410_v46 = vmul.f32 %v408_v44, %v400_v29 }
 0x252   :  { %v413_v47 = vsub.f32 2.0, %v411_v45 }
 0x253   :  { %v412_v48 = vsub.f32 2.0, %v410_v46 }
 0x254   :  { %v415_v49 = vmul.f32 %v413_v47, %v409_v43 }
 0x255   :  { %v414_v50 = vmul.f32 %v412_v48, %v408_v44 }
 0x256   :  { %v417_v51 = vmul.f32 %v415_v49, %v391_v35 }
 0x257   :  { %v416_v52 = vmul.f32 %v414_v50, %v390_v36 }
 0x259   :  { %v418_v53 = vadd.f32 %v417_v51, %v416_v52 }
 0x25b   :  { %v419_v54 = vrot.slane %v418_v53, 4 }
 0x25d   :  { %v420_v55 = vadd.f32 %v419_v54, %v418_v53 }
 0x25f   :  { %v421_v56 = vrot.slane %v420_v55, 2 }
 0x261   :  { %v422_v57 = vadd.f32 %v421_v56, %v420_v55 }
 0x263   :  { %v423_v58 = vrot.slane %v422_v57, 1 }
 0x265   :  { %v424_v59 = vadd.f32 %v423_v58, %v422_v57 }
 0x267   :  { %425 = vst [vmem:[#allocation10] sm:$0x1] %v424_v59 }
 0x268   :  { %743 = shalt.err (!%p740_p8)
}
 0x269   :  { %s744_s14 = scalar_lea.hbm %s894_s4, 16 }
 0x26a   :  { %p745_p9 = scmp.ne.s32.totalorder %s894_s4, %s744_s14  ;;  %p748_p10 = scmp.lt.u32.totalorder %s744_s14, %s894_s4 }
 0x26c   :  { %p750_p11 = pnand %p748_p10, %p745_p9 }
 0x26e   :  { %753 = shalt.err (!%p750_p11)
}
 0x26f   :  { %435 = dma.vmem_to_hbm [thread:$0]  %s433_s27, 16, %s894_s4, [#allocation4]  }
 0x270   :  { %760 = dma.done.wait [#allocation4], 16  }
 0x271   :  { %761 = vsyncadd [#allocation4], 4294967280 }
 0x272   :  { %439 = vsyncpa [#allocation3], 1 }
 0x273   :  { %440 = vsyncpa [#allocation6], 1 }
 0x274   :  { %441 = vsyncpa [#allocation9], 1 }
 0x275   :  { %442 = vsyncpa [#allocation4], 1 }

</bundles_post_ra>
